<compile_context>
chip_gen: v6e
topology: v6e:2x2x1
jax: 0.10.0
libtpu: 0.0.40
codegen_flags: <defaults>
</compile_context>

<pallas_src>
import jax
import jax.numpy as jnp
import numpy as np
from jax.experimental import pallas as pl
from jax.experimental.pallas import tpu as pltpu

IMAGENET_DEFAULT_MEAN = (0.485, 0.456, 0.406)
IMAGENET_DEFAULT_STD = (0.229, 0.224, 0.225)

# Per-step spatial tile (lanes). 256*128 -> ~3.1 MB input + ~4.2 MB output block,
# ~15 MB double-buffered: fits every generation (incl. v7x 64 MiB) with headroom.
_MAX_TILE_S = 256 * 128


def _interp_plan(t_in, t_out):
    """Static linear-resampling plan ('FixSequenceInterpolation'): t_in -> t_out frames."""
    plan = []
    for i in range(t_out):
        p = 0.0 if t_out == 1 else i * (t_in - 1) / (t_out - 1)
        lo = int(p)
        hi = min(lo + 1, t_in - 1)
        plan.append((lo, hi, float(p - lo)))
    return tuple(plan)


def _build_affine(T, C, plan, mean, std, in_scale):
    """Fold lerp weights, frame diffs, Normalize (and an input scale such as 1/255)
    into out(row, s) = A @ x(row, s) + b.

    Input row  index: t * C + c   (native (T, C, H, W) row-major flatten)
    Output row index: c * (F + 1) + k, k in [0, F]  ->  reshapes to (C, F+1, H, W)
    """
    F = len(plan)                       # num_frames + 1 interpolated frames
    R = C * (F + 1)
    A = np.zeros((R, T * C), np.float32)
    b = np.zeros((R, 1), np.float32)
    inv_std = [1.0 / float(s) for s in std]
    for c in range(C):
        sc = inv_std[c]
        r0 = c * (F + 1)
        # slot 0: apex - onset = (x1 - x0) * inv_std  (mean cancels)
        A[r0 + 0, 1 * C + c] += sc
        A[r0 + 0, 0 * C + c] -= sc
        # slots 1..F-1: diffs of time-interpolated normalized frames.
        # Lerp weights sum to 1, so normalize(lerp(x)) == lerp(normalize(x)) and the
        # mean cancels in every diff — keep this invariant if editing.
        for i in range(1, F):
            lo_i, hi_i, w_i = plan[i]
            lo_p, hi_p, w_p = plan[i - 1]
            A[r0 + i, lo_i * C + c] += (1.0 - w_i) * sc
            A[r0 + i, hi_i * C + c] += w_i * sc
            A[r0 + i, lo_p * C + c] -= (1.0 - w_p) * sc
            A[r0 + i, hi_p * C + c] -= w_p * sc
        # slot F: normalized apex = (x1 - mean) * inv_std
        A[r0 + F, 1 * C + c] += sc
        b[r0 + F, 0] = -float(mean[c]) * sc
    A *= in_scale                        # e.g. fold ToTensor's /255 for uint8 input
    return jnp.asarray(A), jnp.asarray(b)


def _pick_tile_s(S):
    """Largest 128-multiple divisor of S <= _MAX_TILE_S (no ragged edge blocks)."""
    if S <= _MAX_TILE_S:
        return S
    if S % 128 == 0:
        units = S // 128
        max_units = _MAX_TILE_S // 128
        best = 1
        for d in range(1, max_units + 1):
            if units % d == 0:
                best = d
        return best * 128
    # TODO(synk): S not 128-aligned -> ragged last block (masked edge stores).
    return _MAX_TILE_S


def _fusenet_kernel(a_ref, b_ref, x_ref, out_ref):
    # a_ref  : (R, T*C)      constant affine matrix (resident, tiny)
    # b_ref  : (R, 1)        constant bias (only the apex rows are non-zero)
    # x_ref  : (T*C, TILE_S) raw pixels, one spatial tile, all frames/channels
    # out_ref: (R, TILE_S)   R = C * (num_frames + 2)
    x = x_ref[...].astype(jnp.float32)
    y = jnp.dot(
        a_ref[...],
        x,
        preferred_element_type=jnp.float32,
        precision=jax.lax.Precision.HIGHEST,
    )
    out_ref[...] = (y + b_ref[...]).astype(out_ref.dtype)


def fusenet_transform2(x_tchw, num_frames=16, out_dtype=jnp.float32):
    """x_tchw: (T, C, H, W), float in [0, 1] or uint8 in [0, 255], already spatially
    resized.  Returns (C, num_frames + 2, H, W) in out_dtype."""
    # TODO(synk): PIL bicubic Resize / RandomRotation / RandomCrop (space_transforms)
    # have no clean Pallas equivalent; val-mode Resize is treated as identity here.
    T, C, H, W = x_tchw.shape
    assert C == 3, "ImageNet mean/std normalization assumes 3 channels"
    assert T >= 2, "need at least onset + apex frames"
    F = num_frames + 1                      # interpolated frame count (frames_mode=0)
    R = C * (F + 1)                         # output rows = C * (num_frames + 2)
    plan = _interp_plan(T, F)

    if x_tchw.dtype == jnp.uint8:
        in_scale = 1.0 / 255.0              # fold ToTensor's /255 into A (no extra HBM pass)
    else:
        in_scale = 1.0
        x_tchw = x_tchw.astype(jnp.float32)

    A, b = _build_affine(T, C, plan, IMAGENET_DEFAULT_MEAN, IMAGENET_DEFAULT_STD, in_scale)

    # Flatten to lane-dense 2-D slabs (free row-major reshapes, no transpose).
    S = H * W
    tile_s = _pick_tile_s(S)
    x_flat = x_tchw.reshape(T * C, S)

    in_bytes = x_flat.size * x_flat.dtype.itemsize
    out_bytes = R * S * jnp.dtype(out_dtype).itemsize
    cost = pl.CostEstimate(
        flops=2 * R * (T * C) * S,
        transcendentals=0,
        bytes_accessed=in_bytes + out_bytes,
    )

    out = pl.pallas_call(
        _fusenet_kernel,
        out_shape=jax.ShapeDtypeStruct((R, S), out_dtype),
        grid=(pl.cdiv(S, tile_s),),
        in_specs=[
            pl.BlockSpec((R, T * C), lambda s: (0, 0)),        # A (constant, resident)
            pl.BlockSpec((R, 1), lambda s: (0, 0)),            # b (constant, resident)
            pl.BlockSpec((T * C, tile_s), lambda s: (0, s)),   # x slab, spatial tile s
        ],
        out_specs=pl.BlockSpec((R, tile_s), lambda s: (0, s)),
        compiler_params=pltpu.CompilerParams(
            dimension_semantics=("parallel",),   # spatial tiles are independent (v7x 2 TCs)
            vmem_limit_bytes=32 * 1024 * 1024,
        ),
        cost_estimate=cost,
    )(A, b, x_flat)
    return out.reshape(C, F + 1, H, W)


def _reference(x_tchw, num_frames=16):
    """Pure-JAX reference mirroring the PyTorch forward (float input in [0, 1])."""
    T, C, H, W = x_tchw.shape
    mean = jnp.asarray(IMAGENET_DEFAULT_MEAN, jnp.float32).reshape(1, C, 1, 1)
    std = jnp.asarray(IMAGENET_DEFAULT_STD, jnp.float32).reshape(1, C, 1, 1)
    z = (x_tchw - mean) / std                                   # (T, C, H, W)
    onset_apex = jnp.transpose(z[:2], (1, 0, 2, 3))             # (C, 2, H, W)

    F = num_frames + 1
    pos = jnp.linspace(0.0, T - 1, F)
    lo = jnp.floor(pos).astype(jnp.int32)
    hi = jnp.minimum(lo + 1, T - 1)
    w = (pos - lo.astype(jnp.float32)).reshape(F, 1, 1, 1)
    xf = x_tchw[lo] * (1.0 - w) + x_tchw[hi] * w
    zf = (xf - mean) / std
    frames = jnp.transpose(zf, (1, 0, 2, 3))                    # (C, F, H, W)

    apex_sub_onset = onset_apex[:, -1] - onset_apex[:, 0]       # (C, H, W)
    fdiff = frames[:, 1:] - frames[:, :-1]                      # (C, num_frames, H, W)
    return jnp.concatenate(
        [apex_sub_onset[:, None], fdiff, onset_apex[:, 1][:, None]], axis=1
    )


if __name__ == "__main__":
    key = jax.random.PRNGKey(0)
    T, C, H, W = 8, 3, 16, 16      # small example: 8 input frames, RGB, 16x16
    num_frames = 8

    x = jax.random.uniform(key, (T, C, H, W), dtype=jnp.float32)  # "images" in [0, 1]

    # f32 path vs reference
    out = jax.block_until_ready(fusenet_transform2(x, num_frames=num_frames))
    ref = _reference(x, num_frames=num_frames)
    assert out.shape == (C, num_frames + 2, H, W), out.shape
    np.testing.assert_allclose(np.asarray(out), np.asarray(ref), rtol=1e-5, atol=1e-5)

    # uint8 input path (ToTensor's /255 folded into the affine matrix)
    x_u8 = (x * 255.0).astype(jnp.uint8)
    out_u8 = jax.block_until_ready(fusenet_transform2(x_u8, num_frames=num_frames))
    ref_u8 = _reference(x_u8.astype(jnp.float32) / 255.0, num_frames=num_frames)
    np.testing.assert_allclose(np.asarray(out_u8), np.asarray(ref_u8), rtol=1e-5, atol=1e-5)

    # bf16 output path (cuts ~half the dominant write traffic); f32 accumulation, cast at store
    out_bf16 = jax.block_until_ready(
        fusenet_transform2(x, num_frames=num_frames, out_dtype=jnp.bfloat16)
    )
    np.testing.assert_allclose(
        np.asarray(out_bf16, dtype=np.float32), np.asarray(ref), rtol=2e-2, atol=2e-2
    )

    print("KERNEL_OK")
</pallas_src>

<mosaic_0001>
module attributes {stable_mosaic.version = 11 : i64} {
  func.func @_fusenet_kernel(%arg0: i32, %arg1: memref<30x24xf32, #tpu.memory_space<vmem>>, %arg2: memref<30x1xf32, #tpu.memory_space<vmem>>, %arg3: memref<24x256xf32, #tpu.memory_space<vmem>>, %arg4: memref<30x256xf32, #tpu.memory_space<vmem>>) attributes {dimension_semantics = [#tpu.dimension_semantics<parallel>], iteration_bounds = array<i64: 1>, scalar_prefetch = 0 : i64, scratch_operands = 0 : i64, tpu.core_type = #tpu.core_type<tc>, window_params = [{pipeline_mode = #tpu.pipeline_mode<synchronous>, transform_indices = @transform_0, window_bounds = array<i64: 30, 24>}, {pipeline_mode = #tpu.pipeline_mode<synchronous>, transform_indices = @transform_1, window_bounds = array<i64: 30, 1>}, {transform_indices = @transform_2, window_bounds = array<i64: 24, 256>}, {transform_indices = @transform_3, window_bounds = array<i64: 30, 256>}]} {
    %c0 = arith.constant 0 : index
    %c0_0 = arith.constant 0 : index
    %0 = vector.load %arg3[%c0, %c0_0] : memref<24x256xf32, #tpu.memory_space<vmem>>, vector<24x256xf32>
    %c0_1 = arith.constant 0 : index
    %c0_2 = arith.constant 0 : index
    %1 = vector.load %arg1[%c0_1, %c0_2] : memref<30x24xf32, #tpu.memory_space<vmem>>, vector<30x24xf32>
    %cst = arith.constant dense<0.000000e+00> : vector<30x256xf32>
    %2 = tpu.matmul %1, %0, %cst {dimension_numbers = #tpu.dot_dimension_numbers<[1], [0], [0], [1], [0, 0, 1, 1], [], []>, precision = #tpu.contract_precision<fp32>} : vector<30x24xf32>, vector<24x256xf32>, vector<30x256xf32> -> vector<30x256xf32>
    %c0_3 = arith.constant 0 : index
    %c0_4 = arith.constant 0 : index
    %3 = vector.load %arg2[%c0_3, %c0_4] : memref<30x1xf32, #tpu.memory_space<vmem>>, vector<30x1xf32>
    %4 = vector.broadcast %3 : vector<30x1xf32> to vector<30x256xf32>
    %5 = arith.addf %2, %4 : vector<30x256xf32>
    %c0_5 = arith.constant 0 : index
    %c0_6 = arith.constant 0 : index
    %6 = vector.load %arg4[%c0_5, %c0_6] : memref<30x256xf32, #tpu.memory_space<vmem>>, vector<30x256xf32>
    tpu.vector_store %arg4[%c0_5, %c0_6], %5 {strides = array<i32>} : memref<30x256xf32, #tpu.memory_space<vmem>>, vector<30x256xf32>,
    return
  }
  func.func @transform_0(%arg0: i32) -> (i32, i32) {
    %c0_i32 = arith.constant 0 : i32
    %c0_i32_0 = arith.constant 0 : i32
    %c0_i32_1 = arith.constant 0 : i32
    return %c0_i32, %c0_i32_0 : i32, i32
  }
  func.func @transform_1(%arg0: i32) -> (i32, i32) {
    %c0_i32 = arith.constant 0 : i32
    %c0_i32_0 = arith.constant 0 : i32
    %c0_i32_1 = arith.constant 0 : i32
    return %c0_i32, %c0_i32_0 : i32, i32
  }
  func.func @transform_2(%arg0: i32) -> (i32, i32) {
    %c0_i32 = arith.constant 0 : i32
    %c0_i32_0 = arith.constant 0 : i32
    return %c0_i32, %arg0 : i32, i32
  }
  func.func @transform_3(%arg0: i32) -> (i32, i32) {
    %c0_i32 = arith.constant 0 : i32
    %c0_i32_0 = arith.constant 0 : i32
    return %c0_i32, %arg0 : i32, i32
  }
}

</mosaic_0001>

<bundles_post_ra>
// kernel: tpu_custom_call.1
= control target key start
LH: loop header
LB: loop body
LE: loop exit
PB: predicated region body
PF: predicated region fallthrough
CT: control target
= control target key end

     0   :  { %vm49_vm0 = vcmask 195584   ;;  %v779_v9 = vmov 0.0   ;;  %v780_v15 = vmov 0   ;;  %s1012_s0 = inlined_call_operand.vmem [shape: f32[30,24], index: 0, kind: input, shape index: {}]   ;;  %s1013_s1 = inlined_call_operand.vmem [shape: f32[30,1], index: 1, kind: input, shape index: {}]   ;;  %s1014_s2 = inlined_call_operand.vmem [shape: f32[24,256], index: 2, kind: input, shape index: {}]   ;;  %s1015_s3 = inlined_call_operand.hbm [shape: f32[30,256], index: 3, kind: output, shape index: {}]  }
   0x1   :  { %v20_v0 = vld [vmem:[%s1014_s2 + $0x28] sm:$0xff]  ;;  %v19_v1 = vld [vmem:[%s1014_s2 + $0x20] sm:$0xff]  ;;  %v18_v2 = vld [vmem:[%s1014_s2 + $0x18] sm:$0xff]  ;;  %132 = vmatprep.mubr.f32.mxu0 %v779_v9  ;;  %271 = vmatprep.mubr.f32.mxu1 %v779_v9 }
   0x2   :  { %v813_v3 = vand.u32 4294901760, %v20_v0  ;;  %v815_v4 = vand.u32 4294901760, %v19_v1  ;;  %v817_v5 = vand.u32 4294901760, %v18_v2  ;;  %v17_v6 = vld [vmem:[%s1014_s2 + $0x10] sm:$0xff]  ;;  %v16_v7 = vld [vmem:[%s1014_s2 + $0x8] sm:$0xff]  ;;  %v15_v8 = vld [vmem:[%s1014_s2] sm:$0xff]  ;;  %755 = vset.pattern.permute.xlu0 %v780_v15  ;;  %756 = vset.pattern.permute.xlu1 %v780_v15 }
   0x3   :  { %v830_v10 = vand.u32 4294901760, %v17_v6  ;;  %v832_v11 = vand.u32 4294901760, %v16_v7  ;;  %v834_v12 = vand.u32 4294901760, %v15_v8  ;;  %v21_v13 = vld [vmem:[%s1012_s0] sm:$0xff]  ;;  %v22_v14 = vld [vmem:[%s1012_s0 + $0x8] sm:$0xff]  ;;  %v27_v26 = vld [vmem:[%s1013_s1 + $0x10] sm:$0xff] }
   0x4   :  { %89 = vmatprep.subr.mxu0 %v813_v3  ;;  %v844_v16 = vsub.f32 %v20_v0, %v813_v3  ;;  %v51_v17 = vsel %vm49_vm0, %v21_v13, 0  ;;  %v848_v18 = vsub.f32 %v19_v1, %v815_v4  ;;  %v851_v19 = vsub.f32 %v18_v2, %v817_v5  ;;  %v25_v20 = vld [vmem:[%s1013_s1] sm:$0xff]  ;;  %v26_v25 = vld [vmem:[%s1013_s1 + $0x8] sm:$0xff]  ;;  %41 = vperm.xlu1 %756, %v27_v26  }
   0x5   :  { %91 = vmatpush1.msra.mxu0 %v815_v4  ;;  %v857_v21 = vand.u32 4294901760, %v51_v17  ;;  %v860_v22 = vsub.f32 %v17_v6, %v830_v10  ;;  %v863_v23 = vsub.f32 %v16_v7, %v832_v11  ;;  %v54_v24 = vsel %vm49_vm0, %v22_v14, 0  ;;  %31 = vperm.xlu0 %755, %v25_v20  }
   0x6   :  { %93 = vmatprep.subr.mxu0 %v817_v5  ;;  %v205_v27 = vand.u32 4294901760, %v844_v16  ;;  %v211_v28 = vand.u32 4294901760, %v848_v18  ;;  %v217_v29 = vand.u32 4294901760, %v851_v19  ;;  %v876_v30 = vand.u32 4294901760, %v54_v24 }
   0x7   :  { %8 = vsyncpa [#allocation3], 0  ;;  %95 = vmatpush1.msra.mxu0 %v830_v10  ;;  %v880_v31 = vsub.f32 %v51_v17, %v857_v21  ;;  %v223_v32 = vand.u32 4294901760, %v860_v22  ;;  %v229_v33 = vand.u32 4294901760, %v863_v23  ;;  %v885_v34 = vsub.f32 %v15_v8, %v834_v12  ;;  %v28_v35 = vld [vmem:[%s1013_s1 + $0x18] sm:$0x3f] }
   0x8   :  { %97 = vmatprep.subr.mxu0 %v832_v11  ;;  %v206_v36 = vsub.f32 %v844_v16, %v205_v27  ;;  %v212_v37 = vsub.f32 %v848_v18, %v211_v28  ;;  %v218_v38 = vsub.f32 %v851_v19, %v217_v29  ;;  %v901_v39 = vsub.f32 %v54_v24, %v876_v30  ;;  %v23_v44 = vld [vmem:[%s1012_s0 + $0x10] sm:$0xff]  ;;  %v24_v45 = vld [vmem:[%s1012_s0 + $0x18] sm:$0x3f]  ;;  %s781_s0 = smov [#allocation2]  }
   0x9   :  { %99 = vmatpush1.msra.mxu0 %v834_v12  ;;  %v135_v40 = vand.u32 4294901760, %v880_v31  ;;  %v224_v41 = vsub.f32 %v860_v22, %v223_v32  ;;  %v230_v42 = vsub.f32 %v863_v23, %v229_v33  ;;  %v235_v43 = vand.u32 4294901760, %v885_v34  ;;  %36 = vperm.xlu0 %755, %v26_v25   ;;  %s739_s11 = sshll.u32 %s781_s0, 4  ;;  %s740_s11 = int_to_ptr.vmem [resolvable:$true] %s739_s11 }
   0xa   :  { %v207_v46 = vand.u32 4294901760, %v206_v36  ;;  %v213_v47 = vand.u32 4294901760, %v212_v37  ;;  %v219_v48 = vand.u32 4294901760, %v218_v38  ;;  %328 = vmatprep.subr.mxu0 %v844_v16  ;;  %v146_v49 = vand.u32 4294901760, %v901_v39  ;;  %46 = vperm.xlu1 %756, %v28_v35   ;;  %s757_s12 = scalar_lea.vmem %s740_s11, 1024  ;;  %p762_p1 = scmp.lt.s32.totalorder %s740_s11, %s740_s11 }
   0xb   :  { %v136_v50 = vsub.f32 %v880_v31, %v135_v40  ;;  %v225_v51 = vand.u32 4294901760, %v224_v41  ;;  %v236_v52 = vsub.f32 %v885_v34, %v235_v43  ;;  %v231_v53 = vand.u32 4294901760, %v230_v42  ;;  %p758_p0 = scmp.ne.s32.totalorder %s740_s11, %s757_s12  ;;  %p763_p2 = scmp.lt.s32.totalorder %s757_s12, %s757_s12 }
   0xc   :  { %208 = vmatprep.subr.mxu1 %v207_v46  ;;  %v147_v54 = vsub.f32 %v901_v39, %v146_v49  ;;  %v57_v55 = vsel %vm49_vm0, %v23_v44, 0  ;;  %v60_v56 = vsel %vm49_vm0, %v24_v45, 0 }
   0xd   :  { %v137_v57 = vand.u32 4294901760, %v136_v50  ;;  %214 = vmatpush1.msra.mxu1 %v213_v47  ;;  %v237_v58 = vand.u32 4294901760, %v236_v52  ;;  %v931_v59 = vand.u32 4294901760, %v57_v55  ;;  %v933_v60 = vand.u32 4294901760, %v60_v56  ;;  %p764_p3 = por %p763_p2, %p762_p1 }
   0xe   :  { %220 = vmatprep.subr.mxu1 %v219_v48  ;;  %v148_v61 = vand.u32 4294901760, %v147_v54 }
   0xf   :  { %138 = vmatmul.mubr.f32.vlgmr.msra.gmra.mxu0 %v137_v57  ;;  %226 = vmatpush1.msra.mxu1 %v225_v51  ;;  %v156_v62 = vsub.f32 %v57_v55, %v931_v59  ;;  %v167_v63 = vsub.f32 %v60_v56, %v933_v60  ;;  %p765_p4 = pnand %p764_p3, %p758_p0 }
  0x10   :  { %143 = vmatprep.mubr.f32.mxu0 %v779_v9  ;;  %232 = vmatprep.subr.mxu1 %v231_v53 }
  0x11   :  { %238 = vmatpush1.msra.mxu1 %v237_v58  ;;  %331 = vmatpush1.msra.mxu0 %v848_v18  ;;  %v157_v0 = vand.u32 4294901760, %v156_v62  ;;  %v168_v1 = vand.u32 4294901760, %v167_v63 }
  0x12   :  { %273 = vmatmul.mubr.f32.vlgmr.msra.gmra.mxu1 %v857_v21  ;;  %436 = vmatprep.subr.mxu1 %v813_v3 }
  0x13   :  { %149 = vmatmul.mubr.f32.gmra.mxu0 %v148_v61  ;;  %438 = vmatpush1.msra.mxu1 %v815_v4  ;;  %v158_v2 = vsub.f32 %v156_v62, %v157_v0  ;;  %v169_v6 = vsub.f32 %v167_v63, %v168_v1 }
  0x14   :  { %154 = vmatprep.mubr.f32.mxu0 %v779_v9  ;;  %278 = vmatprep.mubr.f32.mxu1 %v779_v9 }
  0x15   :  { %v159_v7 = vand.u32 4294901760, %v158_v2  ;;  %334 = vmatprep.subr.mxu0 %v851_v19  ;;  %440 = vmatprep.subr.mxu1 %v817_v5  ;;  %v170_v8 = vand.u32 4294901760, %v169_v6 }
  0x16   :  { %280 = vmatmul.mubr.f32.gmra.mxu1 %v876_v30  ;;  %337 = vmatpush1.msra.mxu0 %v860_v22 }
  0x17   :  { %160 = vmatmul.mubr.f32.gmra.mxu0 %v159_v7  ;;  %285 = vmatprep.mubr.f32.mxu1 %v779_v9 }
  0x18   :  { %165 = vmatprep.mubr.f32.mxu0 %v779_v9  ;;  %442 = vmatpush1.msra.mxu1 %v830_v10 }
  0x19   :  { %340 = vmatprep.subr.mxu0 %v863_v23  ;;  %444 = vmatprep.subr.mxu1 %v832_v11 }
  0x1a   :  { %287 = vmatmul.mubr.f32.gmra.mxu1 %v931_v59  ;;  %343 = vmatpush1.msra.mxu0 %v885_v34 }
  0x1b   :  { %171 = vmatmul.mubr.f32.gmra.mxu0 %v170_v8  ;;  %292 = vmatprep.mubr.f32.mxu1 %v779_v9 }
  0x1c   :  { %376 = vmatprep.mubr.f32.mxu0 %v779_v9  ;;  %446 = vmatpush1.msra.mxu1 %v834_v12 }
  0x1d   :  { %545 = vmatprep.subr.mxu0 %v205_v27  ;;  %654 = vmatprep.subr.mxu1 %v813_v3 }
  0x1e   :  { %294 = vmatmul.mubr.f32.gmra.mxu1 %v933_v60 }
  0x1f   :  { %379 = vmatmul.mubr.f32.vlgmr.msra.gmra.mxu0 %v880_v31  ;;  %479 = vmatprep.mubr.f32.mxu1 %v779_v9 }
  0x20   :  { %384 = vmatprep.mubr.f32.mxu0 %v779_v9  ;;  %549 = vmatpush1.msra.mxu0 %v211_v28 }
  0x21   :  { %553 = vmatprep.subr.mxu0 %v217_v29 }
  0x22   :  { %483 = vmatmul.mubr.f32.vlgmr.msra.gmra.mxu1 %v135_v40  ;;  %557 = vmatpush1.msra.mxu0 %v223_v32 }
  0x23   :  { %387 = vmatmul.mubr.f32.gmra.mxu0 %v901_v39  ;;  %656 = vmatpush1.msra.mxu1 %v815_v4 }
  0x24   :  { %392 = vmatprep.mubr.f32.mxu0 %v779_v9  ;;  %488 = vmatprep.mubr.f32.mxu1 %v779_v9 }
  0x25   :  { %658 = vmatprep.subr.mxu1 %v817_v5  ;;  %561 = vmatprep.subr.mxu0 %v229_v33 }
  0x26   :  { %492 = vmatmul.mubr.f32.gmra.mxu1 %v146_v49  ;;  %565 = vmatpush1.msra.mxu0 %v235_v43 }
  0x27   :  { %395 = vmatmul.mubr.f32.gmra.mxu0 %v156_v62  ;;  %497 = vmatprep.mubr.f32.mxu1 %v779_v9 }
  0x28   :  { %400 = vmatprep.mubr.f32.mxu0 %v779_v9  ;;  %660 = vmatpush1.msra.mxu1 %v830_v10 }
  0x29   :  { %662 = vmatprep.subr.mxu1 %v832_v11 }
  0x2a   :  { %501 = vmatmul.mubr.f32.gmra.mxu1 %v157_v0 }
  0x2b   :  { %403 = vmatmul.mubr.f32.gmra.mxu0 %v167_v63  ;;  %506 = vmatprep.mubr.f32.mxu1 %v779_v9 }
  0x2c   :  { %598 = vmatprep.mubr.f32.mxu0 %v779_v9  ;;  %664 = vmatpush1.msra.mxu1 %v834_v12 }
  0x2e   :  { %510 = vmatmul.mubr.f32.gmra.mxu1 %v168_v1 }
  0x2f   :  { %600 = vmatmul.mubr.f32.vlgmr.msra.gmra.mxu0 %v857_v21  ;;  %697 = vmatprep.mubr.f32.mxu1 %v779_v9 }
  0x30   :  { %605 = vmatprep.mubr.f32.mxu0 %v779_v9 }
  0x32   :  { %699 = vmatmul.mubr.f32.vlgmr.msra.gmra.mxu1 %v857_v21 }
  0x33   :  { %607 = vmatmul.mubr.f32.gmra.mxu0 %v876_v30  ;;  %704 = vmatprep.mubr.f32.mxu1 %v779_v9 }
  0x34   :  { %612 = vmatprep.mubr.f32.mxu0 %v779_v9 }
  0x36   :  { %706 = vmatmul.mubr.f32.gmra.mxu1 %v876_v30 }
  0x37   :  { %614 = vmatmul.mubr.f32.gmra.mxu0 %v931_v59  ;;  %711 = vmatprep.mubr.f32.mxu1 %v779_v9 }
  0x38   :  { %619 = vmatprep.mubr.f32.mxu0 %v779_v9 }
  0x3a   :  { %713 = vmatmul.mubr.f32.gmra.mxu1 %v931_v59 }
  0x3b   :  { %621 = vmatmul.mubr.f32.gmra.mxu0 %v933_v60  ;;  %718 = vmatprep.mubr.f32.mxu1 %v779_v9 }
  0x3e   :  { %720 = vmatmul.mubr.f32.gmra.mxu1 %v933_v60 }
  0x7f   :  { %v42_v34 = vpop.permute.xlu1 %41 }
  0x80   :  { %v32_v24 = vpop.permute.xlu0 %31 }
  0x84   :  { %v37_v32 = vpop.permute.xlu0 %36 }
  0x85   :  { %v47_v49 = vpop.permute.xlu1 %46 }
  0xcf   :  { %v139_v3 = vpop.f32.mrf.mxu0 }
  0xd0   :  { %v140_v30 = vadd.f32 %v139_v3, %v32_v24 }
  0xd1   :  { %v141_v4 = vpop.f32.mrf.mxu0 }
  0xd2   :  { %v274_v5 = vpop.f32.mrf.mxu1  ;;  %v142_v37 = vadd.f32 %v141_v4, %v32_v24 }
  0xd3   :  { %v150_v10 = vpop.f32.mrf.mxu0  ;;  %v275_v38 = vadd.f32 %v274_v5, %v140_v30 }
  0xd4   :  { %v276_v11 = vpop.f32.mrf.mxu1  ;;  %v151_v39 = vadd.f32 %v150_v10, %v37_v32 }
  0xd5   :  { %v152_v12 = vpop.f32.mrf.mxu0  ;;  %v277_v42 = vadd.f32 %v276_v11, %v142_v37 }
  0xd6   :  { %v281_v13 = vpop.f32.mrf.mxu1  ;;  %v153_v47 = vadd.f32 %v152_v12, %v37_v32 }
  0xd7   :  { %v161_v14 = vpop.f32.mrf.mxu0  ;;  %v282_v48 = vadd.f32 %v281_v13, %v151_v39 }
  0xd8   :  { %v283_v15 = vpop.f32.mrf.mxu1  ;;  %v162_v45 = vadd.f32 %v161_v14, %v42_v34 }
  0xd9   :  { %v163_v16 = vpop.f32.mrf.mxu0  ;;  %v284_v54 = vadd.f32 %v283_v15, %v153_v47 }
  0xda   :  { %v288_v17 = vpop.f32.mrf.mxu1  ;;  %v164_v59 = vadd.f32 %v163_v16, %v42_v34 }
  0xdb   :  { %v172_v18 = vpop.f32.mrf.mxu0  ;;  %v289_v60 = vadd.f32 %v288_v17, %v162_v45 }
  0xdc   :  { %v290_v19 = vpop.f32.mrf.mxu1  ;;  %v173_v61 = vadd.f32 %v172_v18, %v47_v49 }
  0xdd   :  { %v174_v20 = vpop.f32.mrf.mxu0  ;;  %v291_v7 = vadd.f32 %v290_v19, %v164_v59 }
  0xde   :  { %v295_v21 = vpop.f32.mrf.mxu1  ;;  %v175_v12 = vadd.f32 %v174_v20, %v47_v49 }
  0xdf   :  { %v380_v22 = vpop.f32.mrf.mxu0  ;;  %v296_v13 = vadd.f32 %v295_v21, %v173_v61 }
  0xe0   :  { %v1006_v23 = vpop.f32.mrf.mxu1  ;;  %v381_v43 = vadd.f32 %v380_v22, %v275_v38 }
  0xe1   :  { %v382_v9 = vpop.f32.mrf.mxu0 }
  0xe2   :  { %v484_v25 = vpop.f32.mrf.mxu1  ;;  %v383_v50 = vadd.f32 %v382_v9, %v277_v42  ;;  %v298_v9 = vadd.f32 %v1006_v23, %v175_v12 }
  0xe3   :  { %v388_v26 = vpop.f32.mrf.mxu0  ;;  %v485_v51 = vadd.f32 %v484_v25, %v381_v43 }
  0xe4   :  { %v486_v27 = vpop.f32.mrf.mxu1  ;;  %v389_v55 = vadd.f32 %v388_v26, %v282_v48 }
  0xe5   :  { %v390_v28 = vpop.f32.mrf.mxu0  ;;  %v487_v56 = vadd.f32 %v486_v27, %v383_v50 }
  0xe6   :  { %v493_v29 = vpop.f32.mrf.mxu1  ;;  %v391_v63 = vadd.f32 %v390_v28, %v284_v54 }
  0xe7   :  { %v396_v31 = vpop.f32.mrf.mxu0  ;;  %v494_v0 = vadd.f32 %v493_v29, %v389_v55 }
  0xe8   :  { %v495_v33 = vpop.f32.mrf.mxu1  ;;  %v397_v3 = vadd.f32 %v396_v31, %v289_v60 }
  0xe9   :  { %v398_v35 = vpop.f32.mrf.mxu0  ;;  %v496_v4 = vadd.f32 %v495_v33, %v391_v63 }
  0xea   :  { %v502_v36 = vpop.f32.mrf.mxu1  ;;  %v399_v15 = vadd.f32 %v398_v35, %v291_v7 }
  0xeb   :  { %v404_v40 = vpop.f32.mrf.mxu0  ;;  %v503_v16 = vadd.f32 %v502_v36, %v397_v3 }
  0xec   :  { %v504_v41 = vpop.f32.mrf.mxu1  ;;  %v405_v19 = vadd.f32 %v404_v40, %v296_v13 }
  0xed   :  { %v406_v44 = vpop.f32.mrf.mxu0  ;;  %v505_v25 = vadd.f32 %v504_v41, %v399_v15 }
  0xee   :  { %v511_v46 = vpop.f32.mrf.mxu1  ;;  %v407_v30 = vadd.f32 %v406_v44, %v298_v9 }
  0xef   :  { %v601_v52 = vpop.f32.mrf.mxu0  ;;  %v512_v20 = vadd.f32 %v511_v46, %v405_v19 }
  0xf0   :  { %v513_v53 = vpop.f32.mrf.mxu1  ;;  %v602_v57 = vadd.f32 %v601_v52, %v485_v51 }
  0xf1   :  { %v603_v58 = vpop.f32.mrf.mxu0  ;;  %v514_v34 = vadd.f32 %v513_v53, %v407_v30 }
  0xf2   :  { %v700_v62 = vpop.f32.mrf.mxu1  ;;  %v604_v1 = vadd.f32 %v603_v58, %v487_v56 }
  0xf3   :  { %v608_v2 = vpop.f32.mrf.mxu0  ;;  %v701_v6 = vadd.f32 %v700_v62, %v602_v57 }
  0xf4   :  { %v702_v8 = vpop.f32.mrf.mxu1  ;;  %v609_v5 = vadd.f32 %v608_v2, %v494_v0 }
  0xf5   :  { %726 = vst [vmem:[#allocation2] sm:$0xff] %v701_v6  ;;  %v610_v10 = vpop.f32.mrf.mxu0  ;;  %v703_v11 = vadd.f32 %v702_v8, %v604_v1 }
  0xf6   :  { %v707_v14 = vpop.f32.mrf.mxu1  ;;  %v611_v17 = vadd.f32 %v610_v10, %v496_v4 }
  0xf7   :  { %727 = vst [vmem:[#allocation2 + $0x8] sm:$0xff] %v703_v11  ;;  %v615_v18 = vpop.f32.mrf.mxu0  ;;  %v708_v22 = vadd.f32 %v707_v14, %v609_v5 }
  0xf8   :  { %v709_v24 = vpop.f32.mrf.mxu1  ;;  %v616_v26 = vadd.f32 %v615_v18, %v503_v16 }
  0xf9   :  { %728 = vst [vmem:[#allocation2 + $0x10] sm:$0xff] %v708_v22  ;;  %v617_v27 = vpop.f32.mrf.mxu0  ;;  %v710_v28 = vadd.f32 %v709_v24, %v611_v17 }
  0xfa   :  { %v714_v29 = vpop.f32.mrf.mxu1  ;;  %v618_v21 = vadd.f32 %v617_v27, %v505_v25 }
  0xfb   :  { %729 = vst [vmem:[#allocation2 + $0x18] sm:$0xff] %v710_v28  ;;  %v622_v31 = vpop.f32.mrf.mxu0  ;;  %v715_v32 = vadd.f32 %v714_v29, %v616_v26 }
  0xfc   :  { %v716_v33 = vpop.f32.mrf.mxu1  ;;  %v623_v35 = vadd.f32 %v622_v31, %v512_v20 }
  0xfd   :  { %730 = vst [vmem:[#allocation2 + $0x20] sm:$0xff] %v715_v32  ;;  %v624_v36 = vpop.f32.mrf.mxu0  ;;  %v717_v23 = vadd.f32 %v716_v33, %v618_v21 }
  0xfe   :  { %v721_v37 = vpop.f32.mrf.mxu1  ;;  %v625_v38 = vadd.f32 %v624_v36, %v514_v34 }
  0xff   :  { %731 = vst [vmem:[#allocation2 + $0x28] sm:$0xff] %v717_v23  ;;  %v722_v39 = vadd.f32 %v721_v37, %v623_v35 }
 0x100   :  { %v723_v40 = vpop.f32.mrf.mxu1 }
 0x101   :  { %732 = vst [vmem:[#allocation2 + $0x30] sm:$0x3f] %v722_v39  ;;  %v724_v41 = vadd.f32 %v723_v40, %v625_v38 }
 0x103   :  { %733 = vst [vmem:[#allocation2 + $0x38] sm:$0x3f] %v724_v41 }
 0x104   :  { %768 = shalt.err (!%p765_p4)
}
 0x105   :  { %s782_s13 = smov 256   ;;  %s783_s14 = smov 16  }
 0x106   :  { %745 = dma.vmem_to_hbm [thread:$0]  %s740_s11, 1024, %s1015_s3, [#allocation3], %s782_s13, %s782_s13, %s783_s14  }
 0x107   :  { %777 = dma.done.wait [#allocation3], 1024  }
 0x108   :  { %778 = vsyncadd [#allocation3], 4294966272 }
 0x109   :  { %749 = vsyncpa [#allocation3], 1 }

</bundles_post_ra>
